<compile_context>
chip_gen: v7x
topology: tpu7x:2x2x1
jax: 0.10.0
libtpu: 0.0.40
codegen_flags: <defaults>
</compile_context>

<pallas_src>
import functools

import jax
import jax.numpy as jnp
from jax.experimental import pallas as pl
from jax.experimental.pallas import tpu as pltpu

EPS = 1e-5


def dwconv_bn_kernel(slabs_ref, w_ref, gamma_ref, beta_ref, o_ref):
    """One grid step = one channel block.

    slabs_ref: (6, N, Hh, W_out, Cb)   slab[(kh%2)*3+kw][n,h,j,c] = x_pad[n, kh%2+2h, kw+2j, c]
    w_ref:     (9, 1, Cb)              depthwise weights, flat tap index kh*3+kw
    gamma_ref: (1, Cb)
    beta_ref:  (1, Cb)
    o_ref:     (N, H_out, W_out, Cb)
    """
    N, H_out, W_out, Cb = o_ref.shape
    cnt = N * H_out * W_out
    # Flatten (N, H_out, W_out) onto the sublane axis when that is a free,
    # tile-aligned reshape; otherwise stay 4-D (still correct).
    flat = (W_out % 8 == 0)

    def load_tap(kh, kw):
        qh = kh // 2
        patch = slabs_ref[(kh % 2) * 3 + kw, :, qh:qh + H_out, :, :]
        return patch.reshape(cnt, Cb) if flat else patch

    # ---- depthwise 3x3, stride 2 (stride folded into the slab decomposition) ----
    acc = None
    for kh in range(3):
        for kw in range(3):
            w_tap = w_ref[kh * 3 + kw]                      # (1, Cb)
            if not flat:
                w_tap = w_tap.reshape(1, 1, 1, Cb)
            term = load_tap(kh, kw) * w_tap
            acc = term if acc is None else acc + term       # first tap seeds acc

    # ---- BatchNorm2d (training-mode batch stats), single pass ----
    red_axes = (0,) if flat else (0, 1, 2)
    inv_cnt = 1.0 / float(cnt)
    s = jnp.sum(acc, axis=red_axes, keepdims=True)
    sq = jnp.sum(acc * acc, axis=red_axes, keepdims=True)
    mean = s * inv_cnt
    # NOTE: E[x^2] - mean^2 can cancel when |mean| >> std; OK at 1e-4 tolerance.
    var = jnp.maximum(sq * inv_cnt - mean * mean, 0.0)

    g = gamma_ref[...]
    b = beta_ref[...]
    if not flat:
        g = g.reshape(1, 1, 1, Cb)
        b = b.reshape(1, 1, 1, Cb)
    scale = g * jax.lax.rsqrt(var + EPS)
    shift = b - mean * scale
    y = acc * scale + shift
    o_ref[...] = y.reshape(N, H_out, W_out, Cb).astype(o_ref.dtype)


def _tensorcores_per_chip():
    """2 TensorCores per chip on v4 / v5p (megacore) / v7x; 1 on v5e / v6e."""
    try:
        kind = jax.devices()[0].device_kind.lower()
    except Exception:
        return 1
    return 2 if any(tag in kind for tag in ("v7", "v4", "v5p")) else 1


@jax.jit
def dwconv3x3s2_bn(x_nchw, w_oihw, gamma, beta):
    """x_nchw: (N, C, H, W) f32; w_oihw: (C, 1, 3, 3) f32 (PyTorch depthwise layout)."""
    N, C, H, W = x_nchw.shape
    assert H % 2 == 0 and W % 2 == 0, "slab decomposition assumes even H, W"

    H_out, W_out = H // 2, W // 2
    Hh = H_out + 1                                  # rows per H-phase of the padded input
    Cp = pl.cdiv(C, 128) * 128                      # lane-dense channel padding: 144 -> 256

    # One 128-lane block per TensorCore where there are 2 TCs; a single lane-dense
    # grid step on 1-TC chips (avoids a serial step that is mostly lane padding).
    block_c = 128 if (_tensorcores_per_chip() >= 2 and Cp >= 256) else Cp

    # ---- layout glue (fuses under jit) ----
    # NCHW -> NHWC, then one pad for both spatial conv padding and lane padding.
    x = jnp.transpose(x_nchw, (0, 2, 3, 1))
    x = jnp.pad(x, ((0, 0), (1, 1), (1, 1), (0, Cp - C)))

    # 6 tap slabs (H-phase ph in {0,1} x kw in {0,1,2}), each (N, Hh, W_out, Cp):
    # every in-kernel tap load becomes a full-extent, sublane-aligned tile.
    slabs = jnp.stack(
        [x[:, ph::2, kw:kw + 2 * W_out:2, :] for ph in (0, 1) for kw in range(3)],
        axis=0)                                      # (6, N, Hh, W_out, Cp)

    w_k = jnp.pad(w_oihw[:, 0, :, :].reshape(C, 9).T, ((0, 0), (0, Cp - C)))
    w_k = w_k.reshape(9, 1, Cp)                      # tap kh*3+kw -> (1, Cp)
    gamma_p = jnp.pad(gamma, (0, Cp - C), constant_values=1.0).reshape(1, Cp)
    beta_p = jnp.pad(beta, (0, Cp - C)).reshape(1, Cp)

    out_padded = pl.pallas_call(
        dwconv_bn_kernel,
        out_shape=jax.ShapeDtypeStruct((N, H_out, W_out, Cp), x_nchw.dtype),
        grid_spec=pltpu.PrefetchScalarGridSpec(
            num_scalar_prefetch=0,
            grid=(Cp // block_c,),
            in_specs=[
                pl.BlockSpec((6, N, Hh, W_out, block_c), lambda c: (0, 0, 0, 0, c)),
                pl.BlockSpec((9, 1, block_c), lambda c: (0, 0, c)),
                pl.BlockSpec((1, block_c), lambda c: (0, c)),
                pl.BlockSpec((1, block_c), lambda c: (0, c)),
            ],
            out_specs=pl.BlockSpec((N, H_out, W_out, block_c),
                                   lambda c: (0, 0, 0, c)),
        ),
        compiler_params=pltpu.CompilerParams(
            dimension_semantics=("parallel",),       # one channel block per TC on 2-TC chips
        ),
    )(slabs, w_k, gamma_p, beta_p)

    # Drop lane padding, NHWC -> NCHW (glue, fused under jit).
    return jnp.transpose(out_padded[..., :C], (0, 3, 1, 2))


if __name__ == "__main__":
    key = jax.random.PRNGKey(0)
    k1, k2, k3, k4 = jax.random.split(key, 4)

    # Module fixes C=144; use a small spatial size consistent with the forward.
    N, C, H, W = 1, 144, 16, 16
    x = jax.random.normal(k1, (N, C, H, W), dtype=jnp.float32)
    w = 0.1 * jax.random.normal(k2, (C, 1, 3, 3), dtype=jnp.float32)    # conv2d10.weight
    gamma = 1.0 + 0.1 * jax.random.normal(k3, (C,), dtype=jnp.float32)  # batchnorm2d10.weight
    beta = 0.1 * jax.random.normal(k4, (C,), dtype=jnp.float32)         # batchnorm2d10.bias

    out = jax.block_until_ready(dwconv3x3s2_bn(x, w, gamma, beta))

    # Pure-JAX reference for sanity.
    conv = jax.lax.conv_general_dilated(
        x, w, window_strides=(2, 2), padding=((1, 1), (1, 1)),
        dimension_numbers=("NCHW", "OIHW", "NCHW"), feature_group_count=C)
    mean = conv.mean(axis=(0, 2, 3), keepdims=True)
    var = ((conv - mean) ** 2).mean(axis=(0, 2, 3), keepdims=True)
    ref = (conv - mean) * jax.lax.rsqrt(var + EPS) * gamma.reshape(1, C, 1, 1) \
        + beta.reshape(1, C, 1, 1)

    assert out.shape == (N, C, H // 2, W // 2)
    assert jnp.allclose(out, ref, atol=1e-4, rtol=1e-4), "mismatch vs reference"
    print("KERNEL_OK")
</pallas_src>

<mosaic_0001>
module attributes {stable_mosaic.version = 11 : i64} {
  func.func @dwconv_bn_kernel(%arg0: i32, %arg1: memref<6x1x9x8x256xf32, #tpu.memory_space<vmem>>, %arg2: memref<9x1x256xf32, #tpu.memory_space<vmem>>, %arg3: memref<1x256xf32, #tpu.memory_space<vmem>>, %arg4: memref<1x256xf32, #tpu.memory_space<vmem>>, %arg5: memref<1x8x8x256xf32, #tpu.memory_space<vmem>>) attributes {dimension_semantics = [#tpu.dimension_semantics<parallel>], iteration_bounds = array<i64: 1>, scalar_prefetch = 0 : i64, scratch_operands = 0 : i64, tpu.core_type = #tpu.core_type<tc>, window_params = [{transform_indices = @transform_0, window_bounds = array<i64: 6, 1, 9, 8, 256>}, {transform_indices = @transform_1, window_bounds = array<i64: 9, 1, 256>}, {transform_indices = @transform_2, window_bounds = array<i64: 1, 256>}, {transform_indices = @transform_3, window_bounds = array<i64: 1, 256>}, {transform_indices = @transform_4, window_bounds = array<i64: 1, 8, 8, 256>}]} {
    %c0 = arith.constant 0 : index
    %c0_0 = arith.constant 0 : index
    %c0_1 = arith.constant 0 : index
    %0 = vector.load %arg2[%c0, %c0_0, %c0_1] : memref<9x1x256xf32, #tpu.memory_space<vmem>>, vector<1x1x256xf32>
    %1 = vector.shape_cast %0 : vector<1x1x256xf32> to vector<1x256xf32>
    %c0_2 = arith.constant 0 : index
    %c0_3 = arith.constant 0 : index
    %c0_4 = arith.constant 0 : index
    %c0_5 = arith.constant 0 : index
    %c0_6 = arith.constant 0 : index
    %2 = vector.load %arg1[%c0_2, %c0_3, %c0_4, %c0_5, %c0_6] : memref<6x1x9x8x256xf32, #tpu.memory_space<vmem>>, vector<1x1x8x8x256xf32>
    %3 = vector.shape_cast %2 : vector<1x1x8x8x256xf32> to vector<1x8x8x256xf32>
    %4 = vector.shape_cast %3 : vector<1x8x8x256xf32> to vector<64x256xf32>
    %5 = vector.broadcast %1 : vector<1x256xf32> to vector<64x256xf32>
    %6 = arith.mulf %4, %5 : vector<64x256xf32>
    %c1 = arith.constant 1 : index
    %c0_7 = arith.constant 0 : index
    %c0_8 = arith.constant 0 : index
    %7 = vector.load %arg2[%c1, %c0_7, %c0_8] : memref<9x1x256xf32, #tpu.memory_space<vmem>>, vector<1x1x256xf32>
    %8 = vector.shape_cast %7 : vector<1x1x256xf32> to vector<1x256xf32>
    %c1_9 = arith.constant 1 : index
    %c0_10 = arith.constant 0 : index
    %c0_11 = arith.constant 0 : index
    %c0_12 = arith.constant 0 : index
    %c0_13 = arith.constant 0 : index
    %9 = vector.load %arg1[%c1_9, %c0_10, %c0_11, %c0_12, %c0_13] : memref<6x1x9x8x256xf32, #tpu.memory_space<vmem>>, vector<1x1x8x8x256xf32>
    %10 = vector.shape_cast %9 : vector<1x1x8x8x256xf32> to vector<1x8x8x256xf32>
    %11 = vector.shape_cast %10 : vector<1x8x8x256xf32> to vector<64x256xf32>
    %12 = vector.broadcast %8 : vector<1x256xf32> to vector<64x256xf32>
    %13 = arith.mulf %11, %12 : vector<64x256xf32>
    %14 = arith.addf %6, %13 : vector<64x256xf32>
    %c2 = arith.constant 2 : index
    %c0_14 = arith.constant 0 : index
    %c0_15 = arith.constant 0 : index
    %15 = vector.load %arg2[%c2, %c0_14, %c0_15] : memref<9x1x256xf32, #tpu.memory_space<vmem>>, vector<1x1x256xf32>
    %16 = vector.shape_cast %15 : vector<1x1x256xf32> to vector<1x256xf32>
    %c2_16 = arith.constant 2 : index
    %c0_17 = arith.constant 0 : index
    %c0_18 = arith.constant 0 : index
    %c0_19 = arith.constant 0 : index
    %c0_20 = arith.constant 0 : index
    %17 = vector.load %arg1[%c2_16, %c0_17, %c0_18, %c0_19, %c0_20] : memref<6x1x9x8x256xf32, #tpu.memory_space<vmem>>, vector<1x1x8x8x256xf32>
    %18 = vector.shape_cast %17 : vector<1x1x8x8x256xf32> to vector<1x8x8x256xf32>
    %19 = vector.shape_cast %18 : vector<1x8x8x256xf32> to vector<64x256xf32>
    %20 = vector.broadcast %16 : vector<1x256xf32> to vector<64x256xf32>
    %21 = arith.mulf %19, %20 : vector<64x256xf32>
    %22 = arith.addf %14, %21 : vector<64x256xf32>
    %c3 = arith.constant 3 : index
    %c0_21 = arith.constant 0 : index
    %c0_22 = arith.constant 0 : index
    %23 = vector.load %arg2[%c3, %c0_21, %c0_22] : memref<9x1x256xf32, #tpu.memory_space<vmem>>, vector<1x1x256xf32>
    %24 = vector.shape_cast %23 : vector<1x1x256xf32> to vector<1x256xf32>
    %c3_23 = arith.constant 3 : index
    %c0_24 = arith.constant 0 : index
    %c0_25 = arith.constant 0 : index
    %c0_26 = arith.constant 0 : index
    %c0_27 = arith.constant 0 : index
    %25 = vector.load %arg1[%c3_23, %c0_24, %c0_25, %c0_26, %c0_27] : memref<6x1x9x8x256xf32, #tpu.memory_space<vmem>>, vector<1x1x8x8x256xf32>
    %26 = vector.shape_cast %25 : vector<1x1x8x8x256xf32> to vector<1x8x8x256xf32>
    %27 = vector.shape_cast %26 : vector<1x8x8x256xf32> to vector<64x256xf32>
    %28 = vector.broadcast %24 : vector<1x256xf32> to vector<64x256xf32>
    %29 = arith.mulf %27, %28 : vector<64x256xf32>
    %30 = arith.addf %22, %29 : vector<64x256xf32>
    %c4 = arith.constant 4 : index
    %c0_28 = arith.constant 0 : index
    %c0_29 = arith.constant 0 : index
    %31 = vector.load %arg2[%c4, %c0_28, %c0_29] : memref<9x1x256xf32, #tpu.memory_space<vmem>>, vector<1x1x256xf32>
    %32 = vector.shape_cast %31 : vector<1x1x256xf32> to vector<1x256xf32>
    %c4_30 = arith.constant 4 : index
    %c0_31 = arith.constant 0 : index
    %c0_32 = arith.constant 0 : index
    %c0_33 = arith.constant 0 : index
    %c0_34 = arith.constant 0 : index
    %33 = vector.load %arg1[%c4_30, %c0_31, %c0_32, %c0_33, %c0_34] : memref<6x1x9x8x256xf32, #tpu.memory_space<vmem>>, vector<1x1x8x8x256xf32>
    %34 = vector.shape_cast %33 : vector<1x1x8x8x256xf32> to vector<1x8x8x256xf32>
    %35 = vector.shape_cast %34 : vector<1x8x8x256xf32> to vector<64x256xf32>
    %36 = vector.broadcast %32 : vector<1x256xf32> to vector<64x256xf32>
    %37 = arith.mulf %35, %36 : vector<64x256xf32>
    %38 = arith.addf %30, %37 : vector<64x256xf32>
    %c5 = arith.constant 5 : index
    %c0_35 = arith.constant 0 : index
    %c0_36 = arith.constant 0 : index
    %39 = vector.load %arg2[%c5, %c0_35, %c0_36] : memref<9x1x256xf32, #tpu.memory_space<vmem>>, vector<1x1x256xf32>
    %40 = vector.shape_cast %39 : vector<1x1x256xf32> to vector<1x256xf32>
    %c5_37 = arith.constant 5 : index
    %c0_38 = arith.constant 0 : index
    %c0_39 = arith.constant 0 : index
    %c0_40 = arith.constant 0 : index
    %c0_41 = arith.constant 0 : index
    %41 = vector.load %arg1[%c5_37, %c0_38, %c0_39, %c0_40, %c0_41] : memref<6x1x9x8x256xf32, #tpu.memory_space<vmem>>, vector<1x1x8x8x256xf32>
    %42 = vector.shape_cast %41 : vector<1x1x8x8x256xf32> to vector<1x8x8x256xf32>
    %43 = vector.shape_cast %42 : vector<1x8x8x256xf32> to vector<64x256xf32>
    %44 = vector.broadcast %40 : vector<1x256xf32> to vector<64x256xf32>
    %45 = arith.mulf %43, %44 : vector<64x256xf32>
    %46 = arith.addf %38, %45 : vector<64x256xf32>
    %c6 = arith.constant 6 : index
    %c0_42 = arith.constant 0 : index
    %c0_43 = arith.constant 0 : index
    %47 = vector.load %arg2[%c6, %c0_42, %c0_43] : memref<9x1x256xf32, #tpu.memory_space<vmem>>, vector<1x1x256xf32>
    %48 = vector.shape_cast %47 : vector<1x1x256xf32> to vector<1x256xf32>
    %c0_44 = arith.constant 0 : index
    %c0_45 = arith.constant 0 : index
    %c1_46 = arith.constant 1 : index
    %c0_47 = arith.constant 0 : index
    %c0_48 = arith.constant 0 : index
    %49 = vector.load %arg1[%c0_44, %c0_45, %c1_46, %c0_47, %c0_48] : memref<6x1x9x8x256xf32, #tpu.memory_space<vmem>>, vector<1x1x8x8x256xf32>
    %50 = vector.shape_cast %49 : vector<1x1x8x8x256xf32> to vector<1x8x8x256xf32>
    %51 = vector.shape_cast %50 : vector<1x8x8x256xf32> to vector<64x256xf32>
    %52 = vector.broadcast %48 : vector<1x256xf32> to vector<64x256xf32>
    %53 = arith.mulf %51, %52 : vector<64x256xf32>
    %54 = arith.addf %46, %53 : vector<64x256xf32>
    %c7 = arith.constant 7 : index
    %c0_49 = arith.constant 0 : index
    %c0_50 = arith.constant 0 : index
    %55 = vector.load %arg2[%c7, %c0_49, %c0_50] : memref<9x1x256xf32, #tpu.memory_space<vmem>>, vector<1x1x256xf32>
    %56 = vector.shape_cast %55 : vector<1x1x256xf32> to vector<1x256xf32>
    %c1_51 = arith.constant 1 : index
    %c0_52 = arith.constant 0 : index
    %c1_53 = arith.constant 1 : index
    %c0_54 = arith.constant 0 : index
    %c0_55 = arith.constant 0 : index
    %57 = vector.load %arg1[%c1_51, %c0_52, %c1_53, %c0_54, %c0_55] : memref<6x1x9x8x256xf32, #tpu.memory_space<vmem>>, vector<1x1x8x8x256xf32>
    %58 = vector.shape_cast %57 : vector<1x1x8x8x256xf32> to vector<1x8x8x256xf32>
    %59 = vector.shape_cast %58 : vector<1x8x8x256xf32> to vector<64x256xf32>
    %60 = vector.broadcast %56 : vector<1x256xf32> to vector<64x256xf32>
    %61 = arith.mulf %59, %60 : vector<64x256xf32>
    %62 = arith.addf %54, %61 : vector<64x256xf32>
    %c8 = arith.constant 8 : index
    %c0_56 = arith.constant 0 : index
    %c0_57 = arith.constant 0 : index
    %63 = vector.load %arg2[%c8, %c0_56, %c0_57] : memref<9x1x256xf32, #tpu.memory_space<vmem>>, vector<1x1x256xf32>
    %64 = vector.shape_cast %63 : vector<1x1x256xf32> to vector<1x256xf32>
    %c2_58 = arith.constant 2 : index
    %c0_59 = arith.constant 0 : index
    %c1_60 = arith.constant 1 : index
    %c0_61 = arith.constant 0 : index
    %c0_62 = arith.constant 0 : index
    %65 = vector.load %arg1[%c2_58, %c0_59, %c1_60, %c0_61, %c0_62] : memref<6x1x9x8x256xf32, #tpu.memory_space<vmem>>, vector<1x1x8x8x256xf32>
    %66 = vector.shape_cast %65 : vector<1x1x8x8x256xf32> to vector<1x8x8x256xf32>
    %67 = vector.shape_cast %66 : vector<1x8x8x256xf32> to vector<64x256xf32>
    %68 = vector.broadcast %64 : vector<1x256xf32> to vector<64x256xf32>
    %69 = arith.mulf %67, %68 : vector<64x256xf32>
    %70 = arith.addf %62, %69 : vector<64x256xf32>
    %cst = arith.constant dense<0.000000e+00> : vector<256xf32>
    %71 = vector.multi_reduction <add>, %70, %cst [0] : vector<64x256xf32> to vector<256xf32>
    %72 = vector.shape_cast %71 : vector<256xf32> to vector<1x256xf32>
    %73 = arith.mulf %70, %70 : vector<64x256xf32>
    %cst_63 = arith.constant dense<0.000000e+00> : vector<256xf32>
    %74 = vector.multi_reduction <add>, %73, %cst_63 [0] : vector<64x256xf32> to vector<256xf32>
    %75 = vector.shape_cast %74 : vector<256xf32> to vector<1x256xf32>
    %cst_64 = arith.constant 1.562500e-02 : f32
    %76 = vector.broadcast %cst_64 : f32 to vector<1x256xf32>
    %77 = arith.mulf %72, %76 : vector<1x256xf32>
    %cst_65 = arith.constant 1.562500e-02 : f32
    %78 = vector.broadcast %cst_65 : f32 to vector<1x256xf32>
    %79 = arith.mulf %75, %78 : vector<1x256xf32>
    %80 = arith.mulf %77, %77 : vector<1x256xf32>
    %81 = arith.subf %79, %80 : vector<1x256xf32>
    %cst_66 = arith.constant 0.000000e+00 : f32
    %82 = vector.broadcast %cst_66 : f32 to vector<1x256xf32>
    %83 = arith.maximumf %81, %82 : vector<1x256xf32>
    %c0_67 = arith.constant 0 : index
    %c0_68 = arith.constant 0 : index
    %84 = vector.load %arg3[%c0_67, %c0_68] : memref<1x256xf32, #tpu.memory_space<vmem>>, vector<1x256xf32>
    %c0_69 = arith.constant 0 : index
    %c0_70 = arith.constant 0 : index
    %85 = vector.load %arg4[%c0_69, %c0_70] : memref<1x256xf32, #tpu.memory_space<vmem>>, vector<1x256xf32>
    %cst_71 = arith.constant 9.99999974E-6 : f32
    %86 = vector.broadcast %cst_71 : f32 to vector<1x256xf32>
    %87 = arith.addf %83, %86 : vector<1x256xf32>
    %88 = math.rsqrt %87 : vector<1x256xf32>
    %89 = arith.mulf %84, %88 : vector<1x256xf32>
    %90 = arith.mulf %77, %89 : vector<1x256xf32>
    %91 = arith.subf %85, %90 : vector<1x256xf32>
    %92 = vector.broadcast %89 : vector<1x256xf32> to vector<64x256xf32>
    %93 = arith.mulf %70, %92 : vector<64x256xf32>
    %94 = vector.broadcast %91 : vector<1x256xf32> to vector<64x256xf32>
    %95 = arith.addf %93, %94 : vector<64x256xf32>
    %96 = vector.shape_cast %95 : vector<64x256xf32> to vector<1x8x8x256xf32>
    %c0_72 = arith.constant 0 : index
    %c0_73 = arith.constant 0 : index
    %c0_74 = arith.constant 0 : index
    %c0_75 = arith.constant 0 : index
    %97 = vector.load %arg5[%c0_72, %c0_73, %c0_74, %c0_75] : memref<1x8x8x256xf32, #tpu.memory_space<vmem>>, vector<1x8x8x256xf32>
    tpu.vector_store %arg5[%c0_72, %c0_73, %c0_74, %c0_75], %96 {strides = array<i32>} : memref<1x8x8x256xf32, #tpu.memory_space<vmem>>, vector<1x8x8x256xf32>,
    return
  }
  func.func @transform_0(%arg0: i32) -> (i32, i32, i32, i32, i32) {
    %c0_i32 = arith.constant 0 : i32
    %c0_i32_0 = arith.constant 0 : i32
    %c0_i32_1 = arith.constant 0 : i32
    %c0_i32_2 = arith.constant 0 : i32
    %c0_i32_3 = arith.constant 0 : i32
    return %c0_i32, %c0_i32_0, %c0_i32_1, %c0_i32_2, %arg0 : i32, i32, i32, i32, i32
  }
  func.func @transform_1(%arg0: i32) -> (i32, i32, i32) {
    %c0_i32 = arith.constant 0 : i32
    %c0_i32_0 = arith.constant 0 : i32
    %c0_i32_1 = arith.constant 0 : i32
    return %c0_i32, %c0_i32_0, %arg0 : i32, i32, i32
  }
  func.func @transform_2(%arg0: i32) -> (i32, i32) {
    %c0_i32 = arith.constant 0 : i32
    %c0_i32_0 = arith.constant 0 : i32
    return %c0_i32, %arg0 : i32, i32
  }
  func.func @transform_3(%arg0: i32) -> (i32, i32) {
    %c0_i32 = arith.constant 0 : i32
    %c0_i32_0 = arith.constant 0 : i32
    return %c0_i32, %arg0 : i32, i32
  }
  func.func @transform_4(%arg0: i32) -> (i32, i32, i32, i32) {
    %c0_i32 = arith.constant 0 : i32
    %c0_i32_0 = arith.constant 0 : i32
    %c0_i32_1 = arith.constant 0 : i32
    %c0_i32_2 = arith.constant 0 : i32
    return %c0_i32, %c0_i32_0, %c0_i32_1, %arg0 : i32, i32, i32, i32
  }
}

</mosaic_0001>

<bundles_post_ra>
// kernel: squeeze.1
= control target key start
LH: loop header
LB: loop body
LE: loop exit
PB: predicated region body
PF: predicated region fallthrough
CT: control target
= control target key end

     0   :  { %vm32_vm0 = vcmask 130048   ;;  %s127_s0 = inlined_call_operand.vmem [shape: f32[144,3,3], index: 0, kind: input, shape index: {}]   ;;  %s128_s1 = inlined_call_operand.vmem [shape: f32[144,9], index: 1, kind: output, shape index: {}]  }
   0x1   :  { %v63_v0 = vld [vmem:[%s127_s0 + $0x14] sm:$0xf]  ;;  %v64_v1 = vld [vmem:[%s127_s0 + $0x10] sm:$0xf]  ;;  %v65_v2 = vld [vmem:[%s127_s0 + $0xc] sm:$0xf] }
   0x2   :  { %8 = vst [vmem:[#allocation0 + $0x28] sm:$0xf] %v63_v0  ;;  %13 = vst [vmem:[#allocation0 + $0x20] sm:$0xf] %v64_v1  ;;  %v66_v3 = vld [vmem:[%s127_s0 + $0x8] sm:$0xf] }
   0x3   :  { %18 = vst [vmem:[#allocation0 + $0x18] sm:$0xf] %v65_v2  ;;  %v67_v4 = vld [vmem:[%s127_s0 + $0x4] sm:$0xf]  ;;  %v28_v5 = vld [vmem:[%s127_s0] sm:$0xf] }
   0x4   :  { %23 = vst [vmem:[#allocation0 + $0x10] sm:$0xf] %v66_v3  ;;  %27 = vst [vmem:[#allocation0 + $0x8] sm:$0xf] %v67_v4 }
   0x5   :  { %29 = vst [vmem:[#allocation0] sm:$0xf] %v28_v5 }
   0x9   :  { %v41_v7 = vld [vmem:[#allocation0 + $0x28] sm:$0x7]   ;;  %v54_v8 = vld [vmem:[#allocation0 + $0x20] sm:$0x7]  }
   0xa   :  { %v36_v6 = vld [vmem:[#allocation0 + $0x18] sm:$0x7]   ;;  %70 = vst.msk [vmem:[%s128_s1 + $0xe] sm:$0x3] %vm32_vm0, %v41_v7   ;;  %71 = vst.msk [vmem:[%s128_s1 + $0x16] sm:$0x4] %vm32_vm0, %v41_v7  }
   0xb   :  { %v31_v9 = vld [vmem:[#allocation0 + $0x8] sm:$0x7]   ;;  %69 = vst.msk [vmem:[%s128_s1 + $0xb] sm:$0x7] %vm32_vm0, %v36_v6   ;;  %v50_v11 = vld [vmem:[#allocation0 + $0x10] sm:$0x7]  }
   0xc   :  { %v47_v10 = vld [vmem:[#allocation0] sm:$0x7]   ;;  %73 = vst [vmem:[%s128_s1 + $0x6] sm:$0x3] %v54_v8   ;;  %74 = vst [vmem:[%s128_s1 + $0xe] sm:$0x4] %v54_v8  }
   0xd   :  { %68 = vst.msk [vmem:[%s128_s1 + $0x8] sm:$0x7] %vm32_vm0, %v31_v9   ;;  %48 = vst [vmem:[%s128_s1] sm:$0x7] %v47_v10  }
   0xe   :  { %72 = vst [vmem:[%s128_s1 + $0x3] sm:$0x7] %v50_v11  }

// kernel: dwconv3x3s2_bn.1
= control target key start
LH: loop header
LB: loop body
LE: loop exit
PB: predicated region body
PF: predicated region fallthrough
CT: control target
= control target key end

     0   :  { %v35_v0 = vlaneseq  ;;  %s1684_s1 = inlined_call_operand.vmem [shape: f32[9,1,256], index: 1, kind: input, shape index: {}]   ;;  %s1685_s0 = inlined_call_operand.vmem [shape: f32[6,1,9,8,256], index: 0, kind: input, shape index: {}]   ;;  %s1686_s2 = inlined_call_operand.vmem [shape: f32[1,256], index: 2, kind: input, shape index: {}]   ;;  %s1687_s3 = inlined_call_operand.vmem [shape: f32[1,256], index: 3, kind: input, shape index: {}]   ;;  %s1688_s4 = inlined_call_operand.vmem [shape: f32[1,8,8,256], index: 4, kind: output, shape index: {}]  }
   0x1   :  { %v17_v4 = vld [vmem:[%s1684_s1] sm:$0x3]  ;;  %v19_v6 = vld [vmem:[%s1685_s0 + $0x8] sm:$0xff]  ;;  %v942_v7 = vld [vmem:[%s1685_s0 + $0x10] sm:$0xff] }
   0x2   :  { %v922_v1 = vshrl.u32 %v35_v0, 7  ;;  %v18_v5 = vld [vmem:[%s1685_s0] sm:$0xff]  ;;  %v947_v8 = vld [vmem:[%s1685_s0 + $0x18] sm:$0xff]  ;;  %v957_v10 = vld [vmem:[%s1685_s0 + $0x28] sm:$0xff] }
   0x3   :  { %v952_v9 = vld [vmem:[%s1685_s0 + $0x20] sm:$0xff]  ;;  %v964_v13 = vld [vmem:[%s1685_s0 + $0x30] sm:$0xff]  ;;  %v969_v14 = vld [vmem:[%s1685_s0 + $0x38] sm:$0xff] }
   0x4   :  { %1729 = vst [vmem:[#allocation2_spill] sm:$0xff] %v922_v1  ;;  %v925_v2 = vsub.s32 0, %v922_v1  ;;  %v928_v3 = vsub.s32 1, %v922_v1  ;;  %v974_v15 = vld [vmem:[%s1685_s0 + $0x40] sm:$0xff]  ;;  %v982_v17 = vld [vmem:[%s1685_s0 + $0x48] sm:$0xff]  ;;  %v987_v18 = vld [vmem:[%s1685_s0 + $0x50] sm:$0xff] }
   0x5   :  { %v755_v16 = vld [vmem:[%s1684_s1 + $0x2] sm:$0x3]  ;;  %v992_v19 = vld [vmem:[%s1685_s0 + $0x58] sm:$0xff]  ;;  %v1002_v21 = vld [vmem:[%s1685_s0 + $0x68] sm:$0xff] }
   0x6   :  { %1730 = vst [vmem:[#allocation3_spill] sm:$0xff] %v925_v2  ;;  %1731 = vst [vmem:[#allocation4_spill] sm:$0xff] %v928_v3  ;;  %v38_v11 = vrot.slane %v17_v4, %v925_v2  ;;  %v42_v12 = vrot.slane %v17_v4, %v928_v3  ;;  %v997_v20 = vld [vmem:[%s1685_s0 + $0x60] sm:$0xff]  ;;  %v1007_v22 = vld [vmem:[%s1685_s0 + $0x70] sm:$0xff]  ;;  %v84_v28 = vrot.slane %v755_v16, %v925_v2 }
   0x7   :  { %1732 = vst [vmem:[#allocation5_spill] sm:$0xff] %v992_v19  ;;  %1733 = vst [vmem:[#allocation6_spill] sm:$0xff] %v997_v20  ;;  %v1012_v23 = vld [vmem:[%s1685_s0 + $0x78] sm:$0xff]  ;;  %v756_v26 = vld [vmem:[%s1685_s0 + $0x90] sm:$0xff]  ;;  %v88_v29 = vrot.slane %v755_v16, %v928_v3 }
   0x8   :  { %1734 = vst [vmem:[#allocation7_spill] sm:$0xff] %v1002_v21  ;;  %1735 = vst [vmem:[#allocation8_spill] sm:$0xff] %v1007_v22  ;;  %v45_v24 = vmul.f32 %v38_v11, %v18_v5  ;;  %v46_v25 = vmul.f32 %v42_v12, %v19_v6  ;;  %v757_v27 = vld [vmem:[%s1685_s0 + $0x98] sm:$0xff]  ;;  %v47_v30 = vmul.f32 %v38_v11, %v942_v7  ;;  %v1029_v34 = vld [vmem:[%s1685_s0 + $0xa0] sm:$0xff] }
   0x9   :  { %1736 = vst [vmem:[#allocation9_spill] sm:$0xff] %v1012_v23  ;;  %v48_v31 = vmul.f32 %v42_v12, %v947_v8  ;;  %v49_v32 = vmul.f32 %v38_v11, %v952_v9  ;;  %v50_v33 = vmul.f32 %v42_v12, %v957_v10  ;;  %1737 = vst [vmem:[#allocation10_spill] sm:$0xff] %v1029_v34  ;;  %v1034_v35 = vld [vmem:[%s1685_s0 + $0xa8] sm:$0xff]  ;;  %v1039_v36 = vld [vmem:[%s1685_s0 + $0xb0] sm:$0xff] }
   0xa   :  { %1738 = vst [vmem:[#allocation11_spill] sm:$0xff] %v1034_v35  ;;  %1739 = vst [vmem:[#allocation12_spill] sm:$0xff] %v1039_v36  ;;  %v51_v37 = vmul.f32 %v38_v11, %v964_v13  ;;  %v52_v38 = vmul.f32 %v42_v12, %v969_v14  ;;  %v53_v39 = vmul.f32 %v38_v11, %v974_v15  ;;  %v1048_v41 = vld [vmem:[%s1685_s0 + $0xb8] sm:$0xff]  ;;  %v1053_v42 = vld [vmem:[%s1685_s0 + $0xc0] sm:$0xff] }
   0xb   :  { %v54_v40 = vmul.f32 %v42_v12, %v982_v17  ;;  %1740 = vst [vmem:[#allocation13_spill] sm:$0xff] %v1048_v41  ;;  %1741 = vst [vmem:[#allocation14_spill] sm:$0xff] %v1053_v42  ;;  %v1058_v43 = vld [vmem:[%s1685_s0 + $0xc8] sm:$0xff]  ;;  %v55_v44 = vmul.f32 %v38_v11, %v987_v18  ;;  %v56_v45 = vmul.f32 %v42_v12, %v992_v19  ;;  %v1067_v48 = vld [vmem:[%s1685_s0 + $0xd0] sm:$0xff] }
   0xc   :  { %1742 = vst [vmem:[#allocation15_spill] sm:$0xff] %v1058_v43  ;;  %v57_v46 = vmul.f32 %v38_v11, %v997_v20  ;;  %v58_v47 = vmul.f32 %v42_v12, %v1002_v21  ;;  %1743 = vst [vmem:[#allocation16_spill] sm:$0xff] %v1067_v48  ;;  %v1072_v49 = vld [vmem:[%s1685_s0 + $0xd8] sm:$0xff]  ;;  %v1077_v50 = vld [vmem:[%s1685_s0 + $0xe0] sm:$0xff]  ;;  %v59_v51 = vmul.f32 %v38_v11, %v1007_v22 }
   0xd   :  { %1744 = vst [vmem:[#allocation17_spill] sm:$0xff] %v1072_v49  ;;  %1745 = vst [vmem:[#allocation18_spill] sm:$0xff] %v1077_v50  ;;  %v60_v52 = vmul.f32 %v42_v12, %v1012_v23  ;;  %v1084_v53 = vld [vmem:[%s1685_s0 + $0xe8] sm:$0xff]  ;;  %v1089_v54 = vld [vmem:[%s1685_s0 + $0xf0] sm:$0xff]  ;;  %v91_v56 = vmul.f32 %v756_v26, %v84_v28  ;;  %v92_v57 = vmul.f32 %v757_v27, %v88_v29 }
   0xe   :  { %1746 = vst [vmem:[#allocation19_spill] sm:$0xff] %v1084_v53  ;;  %1747 = vst [vmem:[#allocation20_spill] sm:$0xff] %v1089_v54  ;;  %v1094_v55 = vld [vmem:[%s1685_s0 + $0xf8] sm:$0xff]  ;;  %v1099_v58 = vld [vmem:[%s1685_s0 + $0x100] sm:$0xff]  ;;  %v93_v60 = vmul.f32 %v1029_v34, %v84_v28  ;;  %v94_v61 = vmul.f32 %v1034_v35, %v88_v29  ;;  %v95_v62 = vmul.f32 %v1039_v36, %v84_v28 }
   0xf   :  { %1748 = vst [vmem:[#allocation21_spill] sm:$0xff] %v1094_v55  ;;  %1749 = vst [vmem:[#allocation22_spill] sm:$0xff] %v1099_v58  ;;  %v1104_v59 = vld [vmem:[%s1685_s0 + $0x108] sm:$0xff]  ;;  %v96_v63 = vmul.f32 %v1048_v41, %v88_v29  ;;  %v97_v0 = vmul.f32 %v1053_v42, %v84_v28  ;;  %v98_v4 = vmul.f32 %v1058_v43, %v88_v29  ;;  %v772_v11 = vld [vmem:[%s1684_s1 + $0x4] sm:$0x3] }
  0x10   :  { %1750 = vst [vmem:[#allocation23_spill] sm:$0xff] %v1104_v59  ;;  %v99_v5 = vmul.f32 %v1067_v48, %v84_v28  ;;  %v100_v6 = vmul.f32 %v1072_v49, %v88_v29  ;;  %v101_v12 = vmul.f32 %v1077_v50, %v84_v28  ;;  %v102_v16 = vmul.f32 %v1084_v53, %v88_v29  ;;  %v773_v36 = vld [vmem:[%s1685_s0 + $0x120] sm:$0xff]  ;;  %v774_v53 = vld [vmem:[%s1685_s0 + $0x128] sm:$0xff]  ;;  %v824_v19 = vld [vmem:[%s1685_s0 + $0x2d0] sm:$0xff] }
  0x11   :  { %v103_v26 = vmul.f32 %v1089_v54, %v84_v28  ;;  %v104_v27 = vmul.f32 %v1094_v55, %v88_v29  ;;  %v105_v1 = vmul.f32 %v1099_v58, %v84_v28  ;;  %v106_v43 = vmul.f32 %v1104_v59, %v88_v29  ;;  %v1132_v55 = vld [vmem:[%s1685_s0 + $0x130] sm:$0xff] }
  0x12   :  { %v107_v42 = vadd.f32 %v91_v56, %v45_v24  ;;  %v108_v48 = vadd.f32 %v92_v57, %v46_v25  ;;  %v109_v41 = vadd.f32 %v93_v60, %v47_v30  ;;  %v110_v49 = vadd.f32 %v94_v61, %v48_v31  ;;  %1751 = vst [vmem:[#allocation24_spill] sm:$0xff] %v1132_v55  ;;  %v1139_v56 = vld [vmem:[%s1685_s0 + $0x138] sm:$0xff]  ;;  %v1144_v57 = vld [vmem:[%s1685_s0 + $0x140] sm:$0xff] }
  0x13   :  { %v146_v28 = vrot.slane %v772_v11, %v925_v2  ;;  %v150_v24 = vrot.slane %v772_v11, %v928_v3  ;;  %v111_v25 = vadd.f32 %v95_v62, %v49_v32  ;;  %v112_v29 = vadd.f32 %v96_v63, %v50_v33  ;;  %1752 = vst [vmem:[#allocation25_spill] sm:$0xff] %v1139_v56  ;;  %v789_v60 = vld [vmem:[%s1684_s1 + $0x6] sm:$0x3]  ;;  %v1162_v62 = vld [vmem:[%s1685_s0 + $0x158] sm:$0xff] }
  0x14   :  { %v113_v30 = vadd.f32 %v97_v0, %v51_v37  ;;  %v114_v31 = vadd.f32 %v98_v4, %v52_v38  ;;  %1753 = vst [vmem:[#allocation26_spill] sm:$0xff] %v1144_v57  ;;  %v115_v61 = vadd.f32 %v99_v5, %v53_v39  ;;  %v116_v11 = vadd.f32 %v100_v6, %v54_v40  ;;  %v1152_v37 = vld [vmem:[%s1685_s0 + $0x148] sm:$0xff]  ;;  %v1157_v38 = vld [vmem:[%s1685_s0 + $0x150] sm:$0xff] }
  0x15   :  { %v117_v32 = vadd.f32 %v101_v12, %v55_v44  ;;  %v118_v33 = vadd.f32 %v102_v16, %v56_v45  ;;  %1754 = vst [vmem:[#allocation27_spill] sm:$0xff] %v1152_v37  ;;  %1755 = vst [vmem:[#allocation28_spill] sm:$0xff] %v1157_v38  ;;  %v119_v63 = vadd.f32 %v103_v26, %v57_v46  ;;  %v1167_v45 = vld [vmem:[%s1685_s0 + $0x160] sm:$0xff]  ;;  %v1172_v0 = vld [vmem:[%s1685_s0 + $0x168] sm:$0xff] }
  0x16   :  { %1756 = vst [vmem:[#allocation29_spill] sm:$0xff] %v1162_v62  ;;  %v120_v39 = vadd.f32 %v104_v27, %v58_v47  ;;  %v121_v40 = vadd.f32 %v105_v1, %v59_v51  ;;  %v122_v44 = vadd.f32 %v106_v43, %v60_v52  ;;  %1757 = vst [vmem:[#allocation30_spill] sm:$0xff] %v1167_v45  ;;  %v1177_v4 = vld [vmem:[%s1685_s0 + $0x170] sm:$0xff]  ;;  %v1182_v1 = vld [vmem:[%s1685_s0 + $0x178] sm:$0xff] }
  0x17   :  { %1758 = vst [vmem:[#allocation31_spill] sm:$0xff] %v1172_v0  ;;  %1759 = vst [vmem:[#allocation32_spill] sm:$0xff] %v1177_v4  ;;  %v1187_v43 = vld [vmem:[%s1685_s0 + $0x180] sm:$0xff]  ;;  %v1192_v46 = vld [vmem:[%s1685_s0 + $0x188] sm:$0xff]  ;;  %v153_v47 = vmul.f32 %v773_v36, %v146_v28  ;;  %v154_v51 = vmul.f32 %v774_v53, %v150_v24  ;;  %v1195_v52 = vrot.slane %v789_v60, %v925_v2 }
  0x18   :  { %1760 = vst [vmem:[#allocation33_spill] sm:$0xff] %v1182_v1  ;;  %1761 = vst [vmem:[#allocation34_spill] sm:$0xff] %v1187_v43  ;;  %v1198_v5 = vrot.slane %v789_v60, %v928_v3  ;;  %v1203_v6 = vld [vmem:[%s1685_s0 + $0x190] sm:$0xff]  ;;  %v1208_v12 = vld [vmem:[%s1685_s0 + $0x198] sm:$0xff]  ;;  %v155_v16 = vmul.f32 %v1132_v55, %v146_v28  ;;  %v156_v36 = vmul.f32 %v1139_v56, %v150_v24 }
  0x19   :  { %1762 = vst [vmem:[#allocation35_spill] sm:$0xff] %v1192_v46  ;;  %1763 = vst [vmem:[#allocation36_spill] sm:$0xff] %v1203_v6  ;;  %v157_v53 = vmul.f32 %v1144_v57, %v146_v28  ;;  %v158_v26 = vmul.f32 %v1152_v37, %v150_v24  ;;  %v159_v27 = vmul.f32 %v1157_v38, %v146_v28 }
  0x1a   :  { %1764 = vst [vmem:[#allocation37_spill] sm:$0xff] %v1208_v12  ;;  %v160_v60 = vmul.f32 %v1162_v62, %v150_v24  ;;  %v161_v59 = vmul.f32 %v1167_v45, %v146_v28  ;;  %v162_v58 = vmul.f32 %v1172_v0, %v150_v24  ;;  %v163_v54 = vmul.f32 %v1177_v4, %v146_v28  ;;  %v790_v45 = vld [vmem:[%s1685_s0 + $0x1b0] sm:$0xff]  ;;  %v791_v4 = vld [vmem:[%s1685_s0 + $0x1b8] sm:$0xff] }
  0x1b   :  { %v164_v50 = vmul.f32 %v1182_v1, %v150_v24  ;;  %v165_v55 = vmul.f32 %v1187_v43, %v146_v28  ;;  %v166_v56 = vmul.f32 %v1192_v46, %v150_v24  ;;  %v167_v57 = vmul.f32 %v1203_v6, %v146_v28  ;;  %v792_v28 = vld [vmem:[%s1685_s0 + $0x1c0] sm:$0xff] }
  0x1c   :  { %v168_v37 = vmul.f32 %v1208_v12, %v150_v24  ;;  %v169_v35 = vadd.f32 %v153_v47, %v107_v42  ;;  %v170_v38 = vadd.f32 %v154_v51, %v108_v48  ;;  %v171_v0 = vadd.f32 %v155_v16, %v109_v41  ;;  %v793_v42 = vld [vmem:[%s1685_s0 + $0x1c8] sm:$0xff]  ;;  %v794_v48 = vld [vmem:[%s1685_s0 + $0x1d0] sm:$0xff]  ;;  %v795_v41 = vld [vmem:[%s1685_s0 + $0x1d8] sm:$0xff] }
  0x1d   :  { %v172_v1 = vadd.f32 %v156_v36, %v110_v49  ;;  %v173_v62 = vadd.f32 %v157_v53, %v111_v25  ;;  %v174_v43 = vadd.f32 %v158_v26, %v112_v29  ;;  %v175_v24 = vadd.f32 %v159_v27, %v113_v30  ;;  %v796_v49 = vld [vmem:[%s1685_s0 + $0x1e0] sm:$0xff]  ;;  %v797_v25 = vld [vmem:[%s1685_s0 + $0x1e8] sm:$0xff] }
  0x1e   :  { %v176_v47 = vadd.f32 %v160_v60, %v114_v31  ;;  %v177_v51 = vadd.f32 %v161_v59, %v115_v61  ;;  %v178_v12 = vadd.f32 %v162_v58, %v116_v11  ;;  %v179_v29 = vadd.f32 %v163_v54, %v117_v32  ;;  %v798_v58 = vld [vmem:[%s1685_s0 + $0x1f0] sm:$0xff]  ;;  %v799_v59 = vld [vmem:[%s1685_s0 + $0x1f8] sm:$0xff]  ;;  %v800_v30 = vld [vmem:[%s1685_s0 + $0x200] sm:$0xff] }
  0x1f   :  { %v180_v16 = vadd.f32 %v164_v50, %v118_v33  ;;  %v181_v36 = vadd.f32 %v165_v55, %v119_v63  ;;  %v182_v53 = vadd.f32 %v166_v56, %v120_v39  ;;  %v183_v31 = vadd.f32 %v167_v57, %v121_v40  ;;  %v801_v50 = vld [vmem:[%s1685_s0 + $0x208] sm:$0xff]  ;;  %v802_v54 = vld [vmem:[%s1685_s0 + $0x210] sm:$0xff]  ;;  %v803_v55 = vld [vmem:[%s1685_s0 + $0x218] sm:$0xff] }
  0x20   :  { %v184_v61 = vadd.f32 %v168_v37, %v122_v44  ;;  %v215_v56 = vmul.f32 %v790_v45, %v1195_v52  ;;  %v216_v11 = vmul.f32 %v791_v4, %v1198_v5  ;;  %v804_v57 = vld [vmem:[%s1685_s0 + $0x220] sm:$0xff]  ;;  %v805_v32 = vld [vmem:[%s1685_s0 + $0x228] sm:$0xff]  ;;  %v217_v33 = vmul.f32 %v792_v28, %v1195_v52 }
  0x21   :  { %v218_v37 = vmul.f32 %v793_v42, %v1198_v5  ;;  %v219_v63 = vmul.f32 %v794_v48, %v1195_v52  ;;  %v220_v39 = vmul.f32 %v795_v41, %v1198_v5  ;;  %v221_v40 = vmul.f32 %v796_v49, %v1195_v52  ;;  %v806_v42 = vld [vmem:[%s1684_s1 + $0x8] sm:$0x3] }
  0x22   :  { %v222_v44 = vmul.f32 %v797_v25, %v1198_v5  ;;  %v223_v45 = vmul.f32 %v798_v58, %v1195_v52  ;;  %v224_v4 = vmul.f32 %v799_v59, %v1198_v5  ;;  %v225_v26 = vmul.f32 %v800_v30, %v1195_v52 }
  0x23   :  { %v226_v27 = vmul.f32 %v801_v50, %v1198_v5  ;;  %v227_v60 = vmul.f32 %v802_v54, %v1195_v52  ;;  %v228_v28 = vmul.f32 %v803_v55, %v1198_v5  ;;  %v229_v48 = vmul.f32 %v804_v57, %v1195_v52  ;;  %v807_v50 = vld [vmem:[%s1685_s0 + $0x240] sm:$0xff]  ;;  %v808_v54 = vld [vmem:[%s1685_s0 + $0x248] sm:$0xff]  ;;  %v809_v52 = vld [vmem:[%s1685_s0 + $0x250] sm:$0xff] }
  0x24   :  { %v230_v41 = vmul.f32 %v805_v32, %v1198_v5  ;;  %v231_v49 = vadd.f32 %v215_v56, %v169_v35  ;;  %v232_v25 = vadd.f32 %v216_v11, %v170_v38  ;;  %v233_v58 = vadd.f32 %v217_v33, %v171_v0  ;;  %v840_v0 = vld [vmem:[%s1684_s1 + $0xc] sm:$0x3]  ;;  %v811_v56 = vld [vmem:[%s1685_s0 + $0x260] sm:$0xff]  ;;  %v857_v11 = vld [vmem:[%s1684_s1 + $0xe] sm:$0x3] }
  0x25   :  { %v234_v59 = vadd.f32 %v218_v37, %v172_v1  ;;  %v235_v6 = vadd.f32 %v219_v63, %v173_v62  ;;  %v236_v30 = vadd.f32 %v220_v39, %v174_v43  ;;  %v237_v55 = vadd.f32 %v221_v40, %v175_v24  ;;  %v823_v62 = vld [vmem:[%s1684_s1 + $0xa] sm:$0x3]  ;;  %v818_v40 = vld [vmem:[%s1685_s0 + $0x298] sm:$0xff] }
  0x26   :  { %v238_v46 = vadd.f32 %v222_v44, %v176_v47  ;;  %v270_v35 = vrot.slane %v806_v42, %v925_v2  ;;  %v274_v38 = vrot.slane %v806_v42, %v928_v3  ;;  %v239_v1 = vadd.f32 %v223_v45, %v177_v51  ;;  %v810_v47 = vld [vmem:[%s1685_s0 + $0x258] sm:$0xff]  ;;  %v813_v51 = vld [vmem:[%s1685_s0 + $0x270] sm:$0xff]  ;;  %v819_v44 = vld [vmem:[%s1685_s0 + $0x2a0] sm:$0xff] }
  0x27   :  { %v240_v43 = vadd.f32 %v224_v4, %v178_v12  ;;  %v241_v5 = vadd.f32 %v225_v26, %v179_v29  ;;  %v242_v24 = vadd.f32 %v226_v27, %v180_v16  ;;  %v243_v57 = vadd.f32 %v227_v60, %v181_v36  ;;  %v812_v12 = vld [vmem:[%s1685_s0 + $0x268] sm:$0xff]  ;;  %v814_v29 = vld [vmem:[%s1685_s0 + $0x278] sm:$0xff]  ;;  %v815_v16 = vld [vmem:[%s1685_s0 + $0x280] sm:$0xff] }
  0x28   :  { %v244_v32 = vadd.f32 %v228_v28, %v182_v53  ;;  %v245_v33 = vadd.f32 %v229_v48, %v183_v31  ;;  %v246_v37 = vadd.f32 %v230_v41, %v184_v61  ;;  %v816_v36 = vld [vmem:[%s1685_s0 + $0x288] sm:$0xff]  ;;  %v817_v53 = vld [vmem:[%s1685_s0 + $0x290] sm:$0xff]  ;;  %v1336_v31 = vrot.slane %v823_v62, %v925_v2  ;;  %v822_v42 = vld [vmem:[%s1685_s0 + $0x2b8] sm:$0xff] }
  0x29   :  { %v1339_v61 = vrot.slane %v823_v62, %v928_v3  ;;  %v1342_v63 = vrot.slane %v840_v0, %v925_v2  ;;  %v1345_v39 = vrot.slane %v840_v0, %v928_v3  ;;  %v820_v45 = vld [vmem:[%s1685_s0 + $0x2a8] sm:$0xff]  ;;  %v277_v4 = vmul.f32 %v807_v50, %v270_v35  ;;  %v821_v28 = vld [vmem:[%s1685_s0 + $0x2b0] sm:$0xff] }
  0x2a   :  { %v278_v26 = vmul.f32 %v808_v54, %v274_v38  ;;  %v1357_v27 = vrot.slane %v857_v11, %v925_v2  ;;  %v1360_v60 = vrot.slane %v857_v11, %v928_v3  ;;  %v279_v48 = vmul.f32 %v809_v52, %v270_v35  ;;  %v825_v52 = vld [vmem:[%s1685_s0 + $0x2d8] sm:$0xff] }
  0x2b   :  { %v280_v41 = vmul.f32 %v810_v47, %v274_v38  ;;  %v281_v62 = vmul.f32 %v811_v56, %v270_v35  ;;  %v282_v0 = vmul.f32 %v812_v12, %v274_v38  ;;  %v283_v50 = vmul.f32 %v813_v51, %v270_v35 }
  0x2c   :  { %1765 = vst [vmem:[#allocation38_spill] sm:$0xff] %v1357_v27  ;;  %1766 = vst [vmem:[#allocation39_spill] sm:$0xff] %v1360_v60  ;;  %v284_v54 = vmul.f32 %v814_v29, %v274_v38  ;;  %v285_v34 = vmul.f32 %v815_v16, %v270_v35  ;;  %v286_v2 = vmul.f32 %v816_v36, %v274_v38  ;;  %v826_v29 = vld [vmem:[%s1685_s0 + $0x2e0] sm:$0xff] }
  0x2d   :  { %v287_v27 = vmul.f32 %v817_v53, %v270_v35  ;;  %v288_v23 = vmul.f32 %v818_v40, %v274_v38  ;;  %v289_v11 = vmul.f32 %v819_v44, %v270_v35  ;;  %v290_v3 = vmul.f32 %v820_v45, %v274_v38 }
  0x2e   :  { %v291_v60 = vmul.f32 %v821_v28, %v270_v35  ;;  %v292_v22 = vmul.f32 %v822_v42, %v274_v38  ;;  %v293_v21 = vadd.f32 %v277_v4, %v231_v49  ;;  %v294_v20 = vadd.f32 %v278_v26, %v232_v25  ;;  %v827_v49 = vld [vmem:[%s1685_s0 + $0x2e8] sm:$0xff]  ;;  %v828_v25 = vld [vmem:[%s1685_s0 + $0x2f0] sm:$0xff] }
  0x2f   :  { %v295_v47 = vadd.f32 %v279_v48, %v233_v58  ;;  %v296_v56 = vadd.f32 %v280_v41, %v234_v59  ;;  %v297_v12 = vadd.f32 %v281_v62, %v235_v6  ;;  %v298_v51 = vadd.f32 %v282_v0, %v236_v30  ;;  %v829_v6 = vld [vmem:[%s1685_s0 + $0x2f8] sm:$0xff]  ;;  %v830_v58 = vld [vmem:[%s1685_s0 + $0x300] sm:$0xff]  ;;  %v831_v59 = vld [vmem:[%s1685_s0 + $0x308] sm:$0xff] }
  0x30   :  { %v299_v35 = vadd.f32 %v283_v50, %v237_v55  ;;  %v300_v38 = vadd.f32 %v284_v54, %v238_v46  ;;  %v301_v16 = vadd.f32 %v285_v34, %v239_v1  ;;  %v302_v36 = vadd.f32 %v286_v2, %v240_v43  ;;  %v832_v2 = vld [vmem:[%s1685_s0 + $0x310] sm:$0xff]  ;;  %v833_v34 = vld [vmem:[%s1685_s0 + $0x318] sm:$0xff]  ;;  %v834_v46 = vld [vmem:[%s1685_s0 + $0x320] sm:$0xff] }
  0x31   :  { %v303_v30 = vadd.f32 %v287_v27, %v241_v5  ;;  %v304_v53 = vadd.f32 %v288_v23, %v242_v24  ;;  %v305_v40 = vadd.f32 %v289_v11, %v243_v57  ;;  %v306_v44 = vadd.f32 %v290_v3, %v244_v32  ;;  %v835_v23 = vld [vmem:[%s1685_s0 + $0x328] sm:$0xff]  ;;  %v836_v3 = vld [vmem:[%s1685_s0 + $0x330] sm:$0xff]  ;;  %v837_v43 = vld [vmem:[%s1685_s0 + $0x338] sm:$0xff] }
  0x32   :  { %v307_v55 = vadd.f32 %v291_v60, %v245_v33  ;;  %v308_v1 = vadd.f32 %v292_v22, %v246_v37  ;;  %v339_v5 = vmul.f32 %v824_v19, %v1336_v31  ;;  %v340_v24 = vmul.f32 %v825_v52, %v1339_v61  ;;  %v838_v22 = vld [vmem:[%s1685_s0 + $0x340] sm:$0xff]  ;;  %v839_v57 = vld [vmem:[%s1685_s0 + $0x348] sm:$0xff] }
  0x33   :  { %v341_v32 = vmul.f32 %v826_v29, %v1336_v31  ;;  %v342_v33 = vmul.f32 %v827_v49, %v1339_v61  ;;  %v343_v37 = vmul.f32 %v828_v25, %v1336_v31  ;;  %v344_v45 = vmul.f32 %v829_v6, %v1339_v61 }
  0x34   :  { %v345_v19 = vmul.f32 %v830_v58, %v1336_v31  ;;  %v346_v4 = vmul.f32 %v831_v59, %v1339_v61  ;;  %v347_v26 = vmul.f32 %v832_v2, %v1336_v31  ;;  %v348_v27 = vmul.f32 %v833_v34, %v1339_v61 }
  0x35   :  { %v349_v60 = vmul.f32 %v834_v46, %v1336_v31  ;;  %v350_v28 = vmul.f32 %v835_v23, %v1339_v61  ;;  %v351_v42 = vmul.f32 %v836_v3, %v1336_v31  ;;  %v352_v48 = vmul.f32 %v837_v43, %v1339_v61 }
  0x36   :  { %v353_v41 = vmul.f32 %v838_v22, %v1336_v31  ;;  %v354_v62 = vmul.f32 %v839_v57, %v1339_v61  ;;  %v355_v0 = vadd.f32 %v339_v5, %v293_v21  ;;  %v356_v50 = vadd.f32 %v340_v24, %v294_v20  ;;  %v855_v21 = vld [vmem:[%s1685_s0 + $0x80] sm:$0xff]  ;;  %v856_v61 = vld [vmem:[%s1685_s0 + $0x88] sm:$0xff] }
  0x37   :  { %v357_v54 = vadd.f32 %v341_v32, %v295_v47  ;;  %v358_v11 = vadd.f32 %v342_v33, %v296_v56  ;;  %v359_v52 = vadd.f32 %v343_v37, %v297_v12  ;;  %v360_v29 = vadd.f32 %v344_v45, %v298_v51 }
  0x38   :  { %v361_v49 = vadd.f32 %v345_v19, %v299_v35  ;;  %v362_v25 = vadd.f32 %v346_v4, %v300_v38  ;;  %v363_v6 = vadd.f32 %v347_v26, %v301_v16  ;;  %v364_v58 = vadd.f32 %v348_v27, %v302_v36  ;;  %v1767_v38 = vld [vmem:[#allocation5_spill] sm:$0xff]  ;;  %v1768_v16 = vld [vmem:[#allocation6_spill] sm:$0xff]  ;;  %v1769_v36 = vld [vmem:[#allocation7_spill] sm:$0xff] }
  0x39   :  { %v365_v59 = vadd.f32 %v349_v60, %v303_v30  ;;  %v366_v2 = vadd.f32 %v350_v28, %v304_v53  ;;  %v367_v34 = vadd.f32 %v351_v42, %v305_v40  ;;  %v368_v46 = vadd.f32 %v352_v48, %v306_v44  ;;  %v1770_v30 = vld [vmem:[#allocation8_spill] sm:$0xff]  ;;  %v1771_v53 = vld [vmem:[#allocation9_spill] sm:$0xff]  ;;  %v1772_v27 = vld [vmem:[#allocation38_spill] sm:$0xff] }
  0x3a   :  { %v369_v23 = vadd.f32 %v353_v41, %v307_v55  ;;  %v370_v3 = vadd.f32 %v354_v62, %v308_v1  ;;  %v401_v31 = vmul.f32 %v1342_v63, %v942_v7  ;;  %v402_v20 = vmul.f32 %v1345_v39, %v947_v8  ;;  %v1775_v28 = vld [vmem:[#allocation11_spill] sm:$0xff]  ;;  %v872_v48 = vld [vmem:[%s1685_s0 + $0x110] sm:$0xff]  ;;  %v873_v41 = vld [vmem:[%s1685_s0 + $0x118] sm:$0xff] }
  0x3b   :  { %v403_v47 = vmul.f32 %v1342_v63, %v952_v9  ;;  %v404_v56 = vmul.f32 %v1345_v39, %v957_v10  ;;  %v405_v7 = vmul.f32 %v1342_v63, %v964_v13  ;;  %v406_v8 = vmul.f32 %v1345_v39, %v969_v14  ;;  %v1776_v62 = vld [vmem:[#allocation12_spill] sm:$0xff] }
  0x3c   :  { %v407_v12 = vmul.f32 %v1342_v63, %v974_v15  ;;  %v408_v51 = vmul.f32 %v1345_v39, %v982_v17  ;;  %v409_v35 = vmul.f32 %v1342_v63, %v987_v18  ;;  %v410_v9 = vmul.f32 %v1345_v39, %v1767_v38 }
  0x3d   :  { %v411_v10 = vmul.f32 %v1342_v63, %v1768_v16  ;;  %v412_v13 = vmul.f32 %v1345_v39, %v1769_v36  ;;  %v413_v14 = vmul.f32 %v1342_v63, %v1770_v30  ;;  %v414_v15 = vmul.f32 %v1345_v39, %v1771_v53 }
  0x3e   :  { %v415_v17 = vmul.f32 %v855_v21, %v1342_v63  ;;  %v416_v40 = vmul.f32 %v856_v61, %v1345_v39  ;;  %v417_v18 = vadd.f32 %v401_v31, %v355_v0  ;;  %v418_v44 = vadd.f32 %v402_v20, %v356_v50  ;;  %v1773_v63 = vld [vmem:[#allocation10_spill] sm:$0xff]  ;;  %v1774_v39 = vld [vmem:[#allocation39_spill] sm:$0xff]  ;;  %v1777_v50 = vld [vmem:[#allocation13_spill] sm:$0xff] }
  0x3f   :  { %v419_v55 = vadd.f32 %v403_v47, %v357_v54  ;;  %v420_v1 = vadd.f32 %v404_v56, %v358_v11  ;;  %v421_v43 = vadd.f32 %v405_v7, %v359_v52  ;;  %v422_v5 = vadd.f32 %v406_v8, %v360_v29  ;;  %v1778_v11 = vld [vmem:[#allocation14_spill] sm:$0xff]  ;;  %v1779_v29 = vld [vmem:[#allocation15_spill] sm:$0xff]  ;;  %v1784_v31 = vld [vmem:[#allocation20_spill] sm:$0xff] }
  0x40   :  { %v423_v24 = vadd.f32 %v407_v12, %v361_v49  ;;  %v424_v22 = vadd.f32 %v408_v51, %v362_v25  ;;  %v425_v57 = vadd.f32 %v409_v35, %v363_v6  ;;  %v426_v32 = vadd.f32 %v410_v9, %v364_v58  ;;  %v874_v25 = vld [vmem:[%s1684_s1 + $0x10] sm:$0x3]  ;;  %v1785_v21 = vld [vmem:[#allocation21_spill] sm:$0xff]  ;;  %v1786_v47 = vld [vmem:[#allocation22_spill] sm:$0xff] }
  0x41   :  { %v427_v33 = vadd.f32 %v411_v10, %v365_v59  ;;  %v428_v37 = vadd.f32 %v412_v13, %v366_v2  ;;  %v429_v45 = vadd.f32 %v413_v14, %v367_v34  ;;  %v430_v19 = vadd.f32 %v414_v15, %v368_v46  ;;  %v1780_v6 = vld [vmem:[#allocation16_spill] sm:$0xff]  ;;  %v1781_v59 = vld [vmem:[#allocation17_spill] sm:$0xff]  ;;  %v1782_v34 = vld [vmem:[#allocation18_spill] sm:$0xff] }
  0x42   :  { %v431_v4 = vadd.f32 %v415_v17, %v369_v23  ;;  %v432_v26 = vadd.f32 %v416_v40, %v370_v3  ;;  %v463_v60 = vmul.f32 %v1773_v63, %v1772_v27  ;;  %v464_v42 = vmul.f32 %v1775_v28, %v1774_v39  ;;  %v1783_v23 = vld [vmem:[#allocation19_spill] sm:$0xff]  ;;  %v1789_v9 = vld [vmem:[#allocation4_spill] sm:$0xff]  ;;  %v1791_v15 = vld [vmem:[#allocation25_spill] sm:$0xff] }
  0x43   :  { %v465_v0 = vmul.f32 %v1776_v62, %v1772_v27  ;;  %v466_v54 = vmul.f32 %v1777_v50, %v1774_v39  ;;  %v467_v52 = vmul.f32 %v1778_v11, %v1772_v27  ;;  %v468_v49 = vmul.f32 %v1779_v29, %v1774_v39  ;;  %v1787_v7 = vld [vmem:[#allocation23_spill] sm:$0xff]  ;;  %v1790_v14 = vld [vmem:[#allocation24_spill] sm:$0xff]  ;;  %v1792_v40 = vld [vmem:[#allocation26_spill] sm:$0xff] }
  0x44   :  { %v469_v58 = vmul.f32 %v1780_v6, %v1772_v27  ;;  %v470_v2 = vmul.f32 %v1781_v59, %v1774_v39  ;;  %v471_v46 = vmul.f32 %v1782_v34, %v1772_v27  ;;  %v472_v3 = vmul.f32 %v1783_v23, %v1774_v39  ;;  %v1788_v35 = vld [vmem:[#allocation3_spill] sm:$0xff]  ;;  %v1794_v29 = vld [vmem:[#allocation28_spill] sm:$0xff]  ;;  %v1800_v34 = vld [vmem:[#allocation34_spill] sm:$0xff] }
  0x45   :  { %v473_v20 = vmul.f32 %v1784_v31, %v1772_v27  ;;  %v474_v61 = vmul.f32 %v1785_v21, %v1774_v39  ;;  %v475_v56 = vmul.f32 %v1786_v47, %v1772_v27  ;;  %v476_v8 = vmul.f32 %v1787_v7, %v1774_v39  ;;  %v1793_v28 = vld [vmem:[#allocation27_spill] sm:$0xff]  ;;  %v1802_v31 = vld [vmem:[#allocation36_spill] sm:$0xff]  ;;  %v1803_v21 = vld [vmem:[#allocation37_spill] sm:$0xff] }
  0x46   :  { %v477_v12 = vmul.f32 %v872_v48, %v1772_v27  ;;  %v478_v51 = vmul.f32 %v873_v41, %v1774_v39  ;;  %v518_v38 = vrot.slane %v874_v25, %v1788_v35  ;;  %v522_v16 = vrot.slane %v874_v25, %v1789_v9  ;;  %v1801_v23 = vld [vmem:[#allocation35_spill] sm:$0xff] }
  0x47   :  { %v479_v10 = vadd.f32 %v463_v60, %v417_v18  ;;  %v480_v36 = vadd.f32 %v464_v42, %v418_v44  ;;  %v481_v13 = vadd.f32 %v465_v0, %v419_v55  ;;  %v482_v30 = vadd.f32 %v466_v54, %v420_v1  ;;  %v1795_v18 = vld [vmem:[#allocation29_spill] sm:$0xff]  ;;  %v1796_v60 = vld [vmem:[#allocation30_spill] sm:$0xff]  ;;  %v1797_v0 = vld [vmem:[#allocation31_spill] sm:$0xff] }
  0x48   :  { %v525_v53 = vmul.f32 %v1790_v14, %v518_v38  ;;  %v526_v17 = vmul.f32 %v1791_v15, %v522_v16  ;;  %v527_v63 = vmul.f32 %v1792_v40, %v518_v38  ;;  %v528_v62 = vmul.f32 %v1793_v28, %v522_v16 }
  0x49   :  { %v483_v50 = vadd.f32 %v467_v52, %v421_v43  ;;  %v484_v27 = vadd.f32 %v468_v49, %v422_v5  ;;  %v485_v48 = vadd.f32 %v469_v58, %v423_v24  ;;  %v486_v39 = vadd.f32 %v470_v2, %v424_v22  ;;  %v1798_v52 = vld [vmem:[#allocation32_spill] sm:$0xff] }
  0x4a   :  { %v487_v41 = vadd.f32 %v471_v46, %v425_v57  ;;  %v488_v11 = vadd.f32 %v472_v3, %v426_v32  ;;  %v529_v25 = vmul.f32 %v1794_v29, %v518_v38  ;;  %v530_v44 = vmul.f32 %v1795_v18, %v522_v16 }
  0x4b   :  { %v489_v55 = vadd.f32 %v473_v20, %v427_v33  ;;  %v490_v1 = vadd.f32 %v474_v61, %v428_v37  ;;  %v531_v42 = vmul.f32 %v1796_v60, %v518_v38  ;;  %v532_v54 = vmul.f32 %v1797_v0, %v522_v16  ;;  %v1799_v33 = vld [vmem:[#allocation33_spill] sm:$0xff] }
  0x4c   :  { %v1517_v6 = vadd.f32 %v525_v53, %v479_v10  ;;  %v1519_v59 = vadd.f32 %v526_v17, %v480_v36  ;;  %v1521_v43 = vadd.f32 %v527_v63, %v481_v13  ;;  %v1523_v5 = vadd.f32 %v528_v62, %v482_v30 }
  0x4d   :  { %v491_v24 = vadd.f32 %v475_v56, %v429_v45  ;;  %v492_v22 = vadd.f32 %v476_v8, %v430_v19  ;;  %v493_v57 = vadd.f32 %v477_v12, %v431_v4  ;;  %v494_v32 = vadd.f32 %v478_v51, %v432_v26  ;;  %v889_v45 = vld [vmem:[%s1685_s0 + $0x1a0] sm:$0xff]  ;;  %v890_v19 = vld [vmem:[%s1685_s0 + $0x1a8] sm:$0xff] }
  0x4e   :  { %v533_v49 = vmul.f32 %v1798_v52, %v518_v38  ;;  %v534_v37 = vmul.f32 %v1799_v33, %v522_v16  ;;  %v1527_v58 = vadd.f32 %v529_v25, %v483_v50  ;;  %v1529_v2 = vadd.f32 %v530_v44, %v484_v27 }
  0x4f   :  { %v535_v46 = vmul.f32 %v1800_v34, %v518_v38  ;;  %v536_v3 = vmul.f32 %v1801_v23, %v522_v16  ;;  %v537_v20 = vmul.f32 %v1802_v31, %v518_v38  ;;  %v538_v61 = vmul.f32 %v1803_v21, %v522_v16 }
  0x50   :  { %v1541_v4 = vadd.f32 %v531_v42, %v485_v48  ;;  %v1543_v26 = vadd.f32 %v532_v54, %v486_v39  ;;  %v557_v47 = vadd.f32 %v1521_v43, %v1517_v6  ;;  %v570_v56 = vadd.f32 %v1523_v5, %v1519_v59 }
  0x51   :  { %v583_v7 = vmul.f32 %v1517_v6, %v1517_v6  ;;  %v584_v8 = vmul.f32 %v1519_v59, %v1519_v59  ;;  %v585_v12 = vmul.f32 %v1521_v43, %v1521_v43  ;;  %v586_v51 = vmul.f32 %v1523_v5, %v1523_v5 }
  0x52   :  { %v1557_v10 = vadd.f32 %v533_v49, %v487_v41  ;;  %v1559_v36 = vadd.f32 %v534_v37, %v488_v11  ;;  %v558_v13 = vadd.f32 %v557_v47, %v1527_v58  ;;  %v571_v30 = vadd.f32 %v570_v56, %v1529_v2 }
  0x53   :  { %v539_v14 = vmul.f32 %v889_v45, %v518_v38  ;;  %v540_v53 = vmul.f32 %v890_v19, %v522_v16  ;;  %v587_v15 = vmul.f32 %v1527_v58, %v1527_v58  ;;  %v588_v17 = vmul.f32 %v1529_v2, %v1529_v2 }
  0x54   :  { %v1567_v40 = vadd.f32 %v535_v46, %v489_v55  ;;  %v1569_v63 = vadd.f32 %v536_v3, %v490_v1  ;;  %v559_v28 = vadd.f32 %v558_v13, %v1541_v4  ;;  %v572_v62 = vadd.f32 %v571_v30, %v1543_v26 }
  0x55   :  { %v589_v50 = vmul.f32 %v1541_v4, %v1541_v4  ;;  %v590_v38 = vmul.f32 %v1543_v26, %v1543_v26  ;;  %v599_v16 = vadd.f32 %v585_v12, %v583_v7  ;;  %v612_v27 = vadd.f32 %v586_v51, %v584_v8 }
  0x56   :  { %v1577_v48 = vadd.f32 %v537_v20, %v491_v24  ;;  %v1579_v39 = vadd.f32 %v538_v61, %v492_v22  ;;  %v560_v41 = vadd.f32 %v559_v28, %v1557_v10  ;;  %v573_v11 = vadd.f32 %v572_v62, %v1559_v36 }
  0x57   :  { %v591_v29 = vmul.f32 %v1557_v10, %v1557_v10  ;;  %v592_v25 = vmul.f32 %v1559_v36, %v1559_v36  ;;  %v600_v18 = vadd.f32 %v599_v16, %v587_v15  ;;  %v613_v44 = vadd.f32 %v612_v27, %v588_v17 }
  0x58   :  { %v1587_v55 = vadd.f32 %v539_v14, %v493_v57  ;;  %v1589_v1 = vadd.f32 %v540_v53, %v494_v32  ;;  %v561_v60 = vadd.f32 %v560_v41, %v1567_v40  ;;  %v574_v42 = vadd.f32 %v573_v11, %v1569_v63 }
  0x59   :  { %v593_v0 = vmul.f32 %v1567_v40, %v1567_v40  ;;  %v594_v54 = vmul.f32 %v1569_v63, %v1569_v63  ;;  %v601_v24 = vadd.f32 %v600_v18, %v589_v50  ;;  %v614_v22 = vadd.f32 %v613_v44, %v590_v38 }
  0x5a   :  { %v562_v52 = vadd.f32 %v561_v60, %v1577_v48  ;;  %v575_v49 = vadd.f32 %v574_v42, %v1579_v39  ;;  %v595_v57 = vmul.f32 %v1577_v48, %v1577_v48  ;;  %v596_v32 = vmul.f32 %v1579_v39, %v1579_v39 }
  0x5b   :  { %v602_v33 = vadd.f32 %v601_v24, %v591_v29  ;;  %v615_v37 = vadd.f32 %v614_v22, %v592_v25  ;;  %v597_v23 = vmul.f32 %v1587_v55, %v1587_v55  ;;  %v598_v3 = vmul.f32 %v1589_v1, %v1589_v1 }
  0x5c   :  { %v563_v34 = vadd.f32 %v562_v52, %v1587_v55  ;;  %v576_v46 = vadd.f32 %v575_v49, %v1589_v1 }
  0x5d   :  { %v603_v31 = vadd.f32 %v602_v33, %v593_v0  ;;  %v616_v20 = vadd.f32 %v615_v37, %v594_v54 }
  0x5e   :  { %v564_v21 = vrot.slane %v563_v34, 4  ;;  %v577_v61 = vrot.slane %v576_v46, 4 }
  0x5f   :  { %v604_v45 = vadd.f32 %v603_v31, %v595_v57  ;;  %v617_v19 = vadd.f32 %v616_v20, %v596_v32  ;;  %v1804_v31 = vld [vmem:[#allocation2_spill] sm:$0xff] }
  0x60   :  { %v565_v47 = vadd.f32 %v564_v21, %v563_v34  ;;  %v578_v56 = vadd.f32 %v577_v61, %v576_v46  ;;  %v896_v34 = vmov 1966171168  }
  0x61   :  { %v605_v7 = vadd.f32 %v604_v45, %v597_v23  ;;  %v618_v8 = vadd.f32 %v617_v19, %v598_v3  ;;  %v645_v46 = vunpack.c.l.s4 %v896_v34  ;;  %v635_v19 = vld [vmem:[%s1686_s2] sm:$0x3] }
  0x62   :  { %v566_v12 = vrot.slane %v565_v47, 2  ;;  %v579_v51 = vrot.slane %v578_v56, 2 }
  0x63   :  { %v606_v13 = vrot.slane %v605_v7, 4  ;;  %v619_v30 = vrot.slane %v618_v8, 4  ;;  %v646_v23 = vunpack.c.0.s8 %v645_v46 }
  0x64   :  { %v567_v14 = vadd.f32 %v566_v12, %v565_v47  ;;  %v580_v53 = vadd.f32 %v579_v51, %v578_v56 }
  0x65   :  { %v607_v15 = vadd.f32 %v606_v13, %v605_v7  ;;  %v620_v17 = vadd.f32 %v619_v30, %v618_v8  ;;  %v649_v20 = vsub.s32 %v646_v23, %v1804_v31 }
  0x66   :  { %v568_v28 = vrot.slane %v567_v14, 1  ;;  %v581_v62 = vrot.slane %v580_v53, 1 }
  0x67   :  { %v608_v50 = vrot.slane %v607_v15, 2  ;;  %v621_v38 = vrot.slane %v620_v17, 2 }
  0x68   :  { %v569_v16 = vadd.f32 %v568_v28, %v567_v14  ;;  %v582_v27 = vadd.f32 %v581_v62, %v580_v53 }
  0x69   :  { %v609_v41 = vadd.f32 %v608_v50, %v607_v15  ;;  %v622_v11 = vadd.f32 %v621_v38, %v620_v17 }
  0x6a   :  { %v625_v29 = vmul.f32 0.015625, %v569_v16  ;;  %v626_v25 = vmul.f32 0.015625, %v582_v27 }
  0x6b   :  { %v610_v18 = vrot.slane %v609_v41, 1  ;;  %v623_v44 = vrot.slane %v622_v11, 1 }
  0x6c   :  { %v629_v0 = vmul.f32 %v625_v29, %v625_v29  ;;  %v630_v54 = vmul.f32 %v626_v25, %v626_v25 }
  0x6d   :  { %v611_v60 = vadd.f32 %v610_v18, %v609_v41  ;;  %v624_v42 = vadd.f32 %v623_v44, %v622_v11 }
  0x6f   :  { %v627_v24 = vmul.f32 0.015625, %v611_v60  ;;  %v628_v22 = vmul.f32 0.015625, %v624_v42 }
  0x71   :  { %v631_v52 = vsub.f32 %v627_v24, %v629_v0  ;;  %v632_v49 = vsub.f32 %v628_v22, %v630_v54 }
  0x73   :  { %v633_v57 = vmax.f32 %v631_v52, 0.0  ;;  %v634_v32 = vmax.f32 %v632_v49, 0.0 }
  0x75   :  { %v637_v33 = vadd.f32 1e-05, %v633_v57  ;;  %v638_v37 = vadd.f32 1e-05, %v634_v32 }
  0x77   :  { %892 = vrsqrt.f32 %v637_v33 }
  0x78   :  { %894 = vrsqrt.f32 %v638_v37 }
  0x81   :  { %v893_v3 = vpop.eup %892 }
  0x82   :  { %v895_v21 = vpop.eup %894 }
  0x83   :  { %v643_v61 = vcombine.low %v893_v3, %v895_v21 }
  0x85   :  { %v650_v45 = vrot.slane %v643_v61, %v649_v20 }
  0x87   :  { %v657_v47 = vrot.slane %v650_v45, %v649_v20 }
  0x89   :  { %v659_v56 = vmul.f32 %v657_v47, %v635_v19 }
  0x8b   :  { %v664_v7 = vrot.slane %v659_v56, %v1788_v35  ;;  %v668_v8 = vrot.slane %v659_v56, %v1789_v9 }
  0x8d   :  { %v671_v12 = vmul.f32 %v664_v7, %v625_v29  ;;  %v672_v51 = vmul.f32 %v668_v8, %v626_v25  ;;  %v692_v13 = vmul.f32 %v664_v7, %v1517_v6  ;;  %v693_v30 = vmul.f32 %v668_v8, %v1519_v59  ;;  %v636_v59 = vld [vmem:[%s1687_s3] sm:$0x3] }
  0x8e   :  { %v694_v14 = vmul.f32 %v664_v7, %v1521_v43  ;;  %v695_v53 = vmul.f32 %v668_v8, %v1523_v5  ;;  %v696_v15 = vmul.f32 %v664_v7, %v1527_v58  ;;  %v697_v17 = vmul.f32 %v668_v8, %v1529_v2 }
  0x8f   :  { %v675_v28 = vcombine.low %v671_v12, %v672_v51  ;;  %v698_v62 = vmul.f32 %v664_v7, %v1541_v4  ;;  %v699_v50 = vmul.f32 %v668_v8, %v1543_v26  ;;  %v700_v38 = vmul.f32 %v664_v7, %v1557_v10 }
  0x90   :  { %v701_v16 = vmul.f32 %v668_v8, %v1559_v36  ;;  %v702_v27 = vmul.f32 %v664_v7, %v1567_v40  ;;  %v703_v4 = vmul.f32 %v668_v8, %v1569_v63  ;;  %v704_v26 = vmul.f32 %v664_v7, %v1577_v48 }
  0x91   :  { %v682_v6 = vrot.slane %v675_v28, %v649_v20  ;;  %v705_v10 = vmul.f32 %v668_v8, %v1579_v39  ;;  %v706_v36 = vmul.f32 %v664_v7, %v1587_v55  ;;  %v707_v41 = vmul.f32 %v668_v8, %v1589_v1 }
  0x93   :  { %v689_v43 = vrot.slane %v682_v6, %v649_v20 }
  0x95   :  { %v691_v5 = vsub.f32 %v636_v59, %v689_v43 }
  0x97   :  { %v712_v58 = vrot.slane %v691_v5, %v1788_v35  ;;  %v716_v2 = vrot.slane %v691_v5, %v1789_v9 }
  0x99   :  { %v719_v11 = vadd.f32 %v712_v58, %v692_v13  ;;  %v720_v29 = vadd.f32 %v716_v2, %v693_v30  ;;  %v721_v25 = vadd.f32 %v712_v58, %v694_v14  ;;  %v722_v18 = vadd.f32 %v716_v2, %v695_v53 }
  0x9a   :  { %v723_v44 = vadd.f32 %v712_v58, %v696_v15  ;;  %v724_v35 = vadd.f32 %v716_v2, %v697_v17  ;;  %v725_v60 = vadd.f32 %v712_v58, %v698_v62  ;;  %v726_v9 = vadd.f32 %v716_v2, %v699_v50 }
  0x9b   :  { %735 = vst [vmem:[%s1688_s4] sm:$0xff] %v719_v11  ;;  %736 = vst [vmem:[%s1688_s4 + $0x8] sm:$0xff] %v720_v29  ;;  %v727_v40 = vadd.f32 %v712_v58, %v700_v38  ;;  %v728_v63 = vadd.f32 %v716_v2, %v701_v16  ;;  %v729_v48 = vadd.f32 %v712_v58, %v702_v27 }
  0x9c   :  { %737 = vst [vmem:[%s1688_s4 + $0x10] sm:$0xff] %v721_v25  ;;  %738 = vst [vmem:[%s1688_s4 + $0x18] sm:$0xff] %v722_v18  ;;  %v730_v39 = vadd.f32 %v716_v2, %v703_v4  ;;  %v731_v55 = vadd.f32 %v712_v58, %v704_v26  ;;  %v732_v1 = vadd.f32 %v716_v2, %v705_v10 }
  0x9d   :  { %739 = vst [vmem:[%s1688_s4 + $0x20] sm:$0xff] %v723_v44  ;;  %740 = vst [vmem:[%s1688_s4 + $0x28] sm:$0xff] %v724_v35  ;;  %v733_v42 = vadd.f32 %v712_v58, %v706_v36  ;;  %v734_v0 = vadd.f32 %v716_v2, %v707_v41 }
  0x9e   :  { %741 = vst [vmem:[%s1688_s4 + $0x30] sm:$0xff] %v725_v60  ;;  %742 = vst [vmem:[%s1688_s4 + $0x38] sm:$0xff] %v726_v9 }
  0x9f   :  { %743 = vst [vmem:[%s1688_s4 + $0x40] sm:$0xff] %v727_v40  ;;  %744 = vst [vmem:[%s1688_s4 + $0x48] sm:$0xff] %v728_v63 }
  0xa0   :  { %745 = vst [vmem:[%s1688_s4 + $0x50] sm:$0xff] %v729_v48  ;;  %746 = vst [vmem:[%s1688_s4 + $0x58] sm:$0xff] %v730_v39 }
  0xa1   :  { %747 = vst [vmem:[%s1688_s4 + $0x60] sm:$0xff] %v731_v55  ;;  %748 = vst [vmem:[%s1688_s4 + $0x68] sm:$0xff] %v732_v1 }
  0xa2   :  { %749 = vst [vmem:[%s1688_s4 + $0x70] sm:$0xff] %v733_v42  ;;  %750 = vst [vmem:[%s1688_s4 + $0x78] sm:$0xff] %v734_v0 }

</bundles_post_ra>
